<compile_context>
chip_gen: v5e
topology: v5e:2x2
jax: 0.10.0
libtpu: 0.0.40
codegen_flags: <defaults>
</compile_context>

<pallas_src>
import jax
import jax.numpy as jnp
from jax.experimental import pallas as pl
from jax.experimental.pallas import tpu as pltpu


def _norm_kernel(stats_ref, x_ref, o_ref):
    # stats_ref lives in SMEM: [scale, shift] = [1/std, -mean/std].
    scale = stats_ref[0]
    shift = stats_ref[1]
    x = x_ref[...].astype(jnp.float32)
    o_ref[...] = (x * scale + shift).astype(o_ref.dtype)


def precomputed_norm(x: jax.Array, mean, std, *, min_kernel_elems: int = 64 * 1024):
    """Apply y = (x - mean) / std elementwise via a Pallas TPU kernel."""
    orig_shape = x.shape
    dtype = x.dtype
    n = x.size

    # Fold stats once (as traced f32 scalars, not Python constants).
    scale = jnp.float32(1.0) / jnp.asarray(std, jnp.float32)
    shift = -jnp.asarray(mean, jnp.float32) * scale
    stats = jnp.stack([scale, shift])  # (2,) float32, goes to SMEM

    def small_path(v):
        return (v.astype(jnp.float32) * scale + shift).astype(dtype)

    # Tiny inputs: kernel-launch + per-step overhead dominates; use fused XLA.
    if n == 0 or n < min_kernel_elems:
        return small_path(x)

    # Pick the widest lane count that divides n exactly (no tail needed).
    lanes = None
    for c in (512, 256, 128):
        if n % c == 0:
            lanes = c
            break

    x_flat = x.reshape(-1)

    if lanes is None:
        # Non-divisible size: run the lane-dense bulk through the kernel and
        # finish the <512-element tail with plain jnp (hot path stays fully
        # unmasked; never fall back to <128-lane masked stores).
        lanes = 512
        n_bulk = (n // lanes) * lanes
        if n_bulk == 0:
            return small_path(x)
        bulk = x_flat[:n_bulk]
        tail = small_path(x_flat[n_bulk:])
    else:
        n_bulk = n
        bulk = x_flat
        tail = None

    m = n_bulk // lanes
    x2d = bulk.reshape(m, lanes)

    # ~1M elements per block (4 MiB at f32); rounded to a sublane multiple.
    # If the whole array is smaller, use the full extent (always legal).
    tile_rows = max(8, ((1 << 20) // lanes) // 8 * 8)
    tile_rows = min(tile_rows, m)

    out2d = pl.pallas_call(
        _norm_kernel,
        out_shape=jax.ShapeDtypeStruct((m, lanes), dtype),
        grid=(pl.cdiv(m, tile_rows),),
        in_specs=[
            pl.BlockSpec(memory_space=pltpu.MemorySpace.SMEM),  # stats (2,) f32
            pl.BlockSpec((tile_rows, lanes), lambda i: (i, 0)),
        ],
        out_specs=pl.BlockSpec((tile_rows, lanes), lambda i: (i, 0)),
        compiler_params=pltpu.CompilerParams(
            dimension_semantics=("parallel",),
            # in + out, double-buffered, at 4 MiB blocks = 16 MiB; pin the
            # scoped-VMEM limit so the same tile works on v5e/v6e/v7x.
            vmem_limit_bytes=32 << 20,
        ),
        # input_output_aliases={1: 0} could be offered when the caller donates
        # x (halves peak HBM footprint); omitted here to keep x reusable.
    )(stats, x2d)

    out_flat = out2d.reshape(-1)
    if tail is not None:
        out_flat = jnp.concatenate([out_flat, tail])
    return out_flat.reshape(orig_shape)


if __name__ == "__main__":
    # Deterministic "precomputed" stats (typical BYOL-A log-mel stats style).
    MEAN = -5.4919104
    STD = 5.0389647

    key = jax.random.PRNGKey(0)

    # BYOL-A-style inputs (batch, channel, frames, mel bins), small shapes:
    #   1) 512 elems   -> single (1, 512) lane-dense block
    #   2) 4096 elems  -> lanes=512, 8 rows, standard kernel path
    #   3) 3003 elems  -> non-divisible: (5, 512) bulk via kernel + 443 tail
    #   4) 160 elems   -> pure-tail (plain jnp) path
    #   5) bf16 input  -> f32 compute inside kernel, cast on store
    tests = [
        ((2, 1, 16, 16), jnp.float32),
        ((2, 4, 16, 32), jnp.float32),
        ((3, 7, 11, 13), jnp.float32),
        ((2, 1, 5, 16), jnp.float32),
        ((2, 1, 16, 32), jnp.bfloat16),
    ]
    for i, (shp, dt) in enumerate(tests):
        k = jax.random.fold_in(key, i)
        x = (jax.random.normal(k, shp, dtype=jnp.float32) * 3.0 - 5.0).astype(dt)

        # min_kernel_elems=0 forces the Pallas path even for these small
        # test shapes (the default bypasses the kernel below 64K elements).
        y = jax.block_until_ready(precomputed_norm(x, MEAN, STD, min_kernel_elems=0))

        y_ref = ((x.astype(jnp.float32) - MEAN) / STD).astype(dt)
        assert y.shape == x.shape and y.dtype == x.dtype, shp
        tol = 1e-5 if dt == jnp.float32 else 2e-2
        assert jnp.allclose(
            y.astype(jnp.float32), y_ref.astype(jnp.float32), atol=tol, rtol=tol
        ), shp

    print("KERNEL_OK")
</pallas_src>

<mosaic_0001>
module attributes {stable_mosaic.version = 11 : i64} {
  func.func @_norm_kernel(%arg0: i32, %arg1: memref<2xf32, #tpu.memory_space<smem>>, %arg2: memref<1x512xf32, #tpu.memory_space<vmem>>, %arg3: memref<1x512xf32, #tpu.memory_space<vmem>>) attributes {dimension_semantics = [#tpu.dimension_semantics<parallel>], iteration_bounds = array<i64: 1>, scalar_prefetch = 0 : i64, scratch_operands = 0 : i64, tpu.core_type = #tpu.core_type<tc>, window_params = [{transform_indices = @transform_0, window_bounds = array<i64: 2>}, {transform_indices = @transform_1, window_bounds = array<i64: 1, 512>}, {transform_indices = @transform_2, window_bounds = array<i64: 1, 512>}]} {
    %c0 = arith.constant 0 : index
    %0 = memref.load %arg1[%c0] : memref<2xf32, #tpu.memory_space<smem>>
    %c1 = arith.constant 1 : index
    %1 = memref.load %arg1[%c1] : memref<2xf32, #tpu.memory_space<smem>>
    %c0_0 = arith.constant 0 : index
    %c0_1 = arith.constant 0 : index
    %2 = vector.load %arg2[%c0_0, %c0_1] : memref<1x512xf32, #tpu.memory_space<vmem>>, vector<1x512xf32>
    %3 = vector.broadcast %0 : f32 to vector<1x512xf32>
    %4 = arith.mulf %2, %3 : vector<1x512xf32>
    %5 = vector.broadcast %1 : f32 to vector<1x512xf32>
    %6 = arith.addf %4, %5 : vector<1x512xf32>
    %c0_2 = arith.constant 0 : index
    %c0_3 = arith.constant 0 : index
    %7 = vector.load %arg3[%c0_2, %c0_3] : memref<1x512xf32, #tpu.memory_space<vmem>>, vector<1x512xf32>
    tpu.vector_store %arg3[%c0_2, %c0_3], %6 {strides = array<i32>} : memref<1x512xf32, #tpu.memory_space<vmem>>, vector<1x512xf32>,
    return
  }
  func.func @transform_0(%arg0: i32) -> i32 {
    %c0_i32 = arith.constant 0 : i32
    %c0_i32_0 = arith.constant 0 : i32
    return %c0_i32 : i32
  }
  func.func @transform_1(%arg0: i32) -> (i32, i32) {
    %c0_i32 = arith.constant 0 : i32
    %c0_i32_0 = arith.constant 0 : i32
    return %arg0, %c0_i32 : i32, i32
  }
  func.func @transform_2(%arg0: i32) -> (i32, i32) {
    %c0_i32 = arith.constant 0 : i32
    %c0_i32_0 = arith.constant 0 : i32
    return %arg0, %c0_i32 : i32, i32
  }
}

</mosaic_0001>

<bundles_post_ra>
// kernel: tpu_custom_call.1
= control target key start
LH: loop header
LB: loop body
LE: loop exit
PB: predicated region body
PF: predicated region fallthrough
CT: control target
= control target key end

     0   :  { %7 = vsyncpa [#allocation5], 0  ;;  %s166_s0 = inlined_call_operand.hbm [shape: f32[2], index: 0, kind: input, shape index: {}]   ;;  %s167_s1 = inlined_call_operand.hbm [shape: f32[1,512], index: 1, kind: input, shape index: {}]   ;;  %s168_s2 = inlined_call_operand.hbm [shape: f32[1,512], index: 2, kind: output, shape index: {}]  }
   0x1   :  { %8 = vsyncpa [#allocation3], 0 }
   0x2   :  { %9 = vsyncpa [#allocation4], 0  ;;  %s15_s11 = sshll.u32 %s166_s0, 4  ;;  %s24_s14 = sshll.u32 %s167_s1, 4  ;;  %s16_s11 = int_to_ptr.hbm [resolvable:$true] %s15_s11  ;;  %s25_s14 = int_to_ptr.hbm [resolvable:$true] %s24_s14 }
   0x3   :  { %s139_s15 = smov [#allocation2]   ;;  %s140_s16 = smov [#allocation6]  }
   0x4   :  { %18 = dma.hbm_to_smem %s16_s11, 16, %s139_s15, [#allocation5]  }
   0x5   :  { %s26_s17 = sshll.u32 %s140_s16, 4  ;;  %s27_s17 = int_to_ptr.vmem [resolvable:$true] %s26_s17 }
   0x6   :  { %29 = dma.hbm_to_vmem [thread:$0]  %s25_s14, 64, %s27_s17, [#allocation3]  }
   0x7   :  { %133 = dma.done.wait [#allocation5], 16  }
   0x8   :  { %134 = vsyncadd [#allocation5], 4294967280 }
   0x9   :  { %135 = dma.done.wait [#allocation3], 64  }
   0xa   :  { %136 = vsyncadd [#allocation3], 4294967232 }
   0xb   :  { %38 = sfence }
   0xc   :  { %s39_s18 = sld [smem:[#allocation2]]  ;;  %v41_v0 = vld [vmem:[#allocation6] sm:$0xf]  ;;  %v46_v1 = vlaneseq  ;;  %s141_s0 = smov [#allocation7]  }
   0xd   :  { %s69_s19 = sld [smem:[#allocation2 + $0x1]]  ;;  %s56_s20 = sshll.u32 %s141_s0, 4  ;;  %s57_s20 = int_to_ptr.vmem [resolvable:$true] %s56_s20 }
   0xe   :  { %s58_s22 = sshll.u32 %s168_s2, 4  ;;  %vm48_vm0 = vcmp.lt.s32.totalorder %v46_v1, 512  ;;  %s59_s22 = int_to_ptr.hbm [resolvable:$true] %s58_s22 }
  0x12   :  { %v42_v2 = vstv %s39_s18 }
  0x13   :  { %v43_v3 = vmul.f32 %v42_v2, %v41_v0  ;;  %v44_v4 = vstv %s69_s19 }
  0x15   :  { %v45_v5 = vadd.f32 %v44_v4, %v43_v3 }
  0x17   :  { %50 = vst.msk [vmem:[#allocation7] sm:$0xf] %vm48_vm0, %v45_v5 }
  0x18   :  { %61 = dma.vmem_to_hbm [thread:$0]  %s57_s20, 64, %s59_s22, [#allocation4]  }
  0x19   :  { %137 = dma.done.wait [#allocation4], 64  }
  0x1a   :  { %138 = vsyncadd [#allocation4], 4294967232 }
  0x1b   :  { %66 = vsyncpa [#allocation3], 1 }
  0x1c   :  { %67 = vsyncpa [#allocation4], 1 }
  0x1d   :  { %68 = vsyncpa [#allocation5], 1 }

</bundles_post_ra>
